<compile_context>
chip_gen: v7x
topology: tpu7x:2x2x1
jax: 0.10.0
libtpu: 0.0.40
codegen_flags: <defaults>
</compile_context>

<pallas_src>
import functools

import numpy as np
import jax
import jax.numpy as jnp
from jax import lax
from jax.experimental import pallas as pl
from jax.experimental.pallas import tpu as pltpu


def _build_pad_mask(H, W, L, cmax):
    """(9*cmax, L) f32 0/1 mask; row block t holds the validity of tap t.

    Lane g corresponds to in-image position p = g % H*W (batch folded on the
    lane axis); tap t = (dy+1)*3 + (dx+1) is valid iff (row+dy, col+dx) is
    inside the image -- exactly the conv zero-padding semantics.  Built with
    numpy at trace time so it is a baked constant (no runtime cost)."""
    P = H * W
    g = np.arange(L)
    p = g % P
    r = p // W
    c = p % W
    mask = np.zeros((9 * cmax, L), np.float32)
    t = 0
    for dy in (-1, 0, 1):
        for dx in (-1, 0, 1):
            valid = ((r + dy >= 0) & (r + dy < H) & (c + dx >= 0) & (c + dx < W))
            mask[t * cmax:(t + 1) * cmax, :] = valid.astype(np.float32)[None, :]
            t += 1
    return mask


def _shortcut_block_kernel(x_ref, mask_ref, w0_ref, b0_ref, w1_ref, b1_ref,
                           o_ref, patch_ref, *, W, cin, cmid, cmax):
    # x_ref    : (cin,  L)        f32   input, channels on sublanes, batch*spatial on lanes
    # mask_ref : (9*cmax, L)      f32   precomputed 0/1 zero-padding masks (constant block)
    # w0_ref   : (cmid, 9*cin)    bf16  conv0 weights, (kh, kw, ci)-major K axis
    # b0_ref   : (cmid, 1)        f32
    # w1_ref   : (cout, 9*cmid)   bf16  conv1 weights
    # b1_ref   : (cout, 1)        f32
    # o_ref    : (cout, L)        f32
    # patch_ref: (9*cmax, L)      bf16  VMEM scratch, im2col patch (reused by both convs)
    L = x_ref.shape[1]
    x = x_ref[...]                                           # (cin, L) f32

    def im2col_to_scratch(a, C):
        # a: (C, L) f32 -> patch_ref[:9*C] holds the bf16 im2col matrix.
        # Tap (dy, dx): shifted[c, g] = a[c, g + dy*W + dx]; the circular roll
        # across row/image boundaries is zeroed by the precomputed mask.
        t = 0
        for dy in (-1, 0, 1):
            for dx in (-1, 0, 1):
                s = dy * W + dx
                rolled = a if s == 0 else pltpu.roll(a, shift=(-s) % L, axis=1)
                m = mask_ref[t * cmax:t * cmax + C, :]       # (C, L) f32, static slice
                # f32 mask-multiply (v5e-safe), per-tap bf16 cast, store to scratch
                # -> live range bounded to a single tap.
                patch_ref[t * C:(t + 1) * C, :] = (rolled * m).astype(jnp.bfloat16)
                t += 1

    # ---- conv0: one MXU matmul (K = 9*cin), bias, ReLU ------------------------
    im2col_to_scratch(x, cin)
    fea = lax.dot_general(w0_ref[...], patch_ref[:9 * cin, :],
                          dimension_numbers=(((1,), (0,)), ((), ())),
                          preferred_element_type=jnp.float32)
    fea = jnp.maximum(fea + b0_ref[...], 0.0)                # (cmid, L) f32

    # ---- conv1: one MXU matmul (K = 9*cmid), bias, residual add ---------------
    im2col_to_scratch(fea, cmid)
    out = lax.dot_general(w1_ref[...], patch_ref[:9 * cmid, :],
                          dimension_numbers=(((1,), (0,)), ((), ())),
                          preferred_element_type=jnp.float32)
    o_ref[...] = (out + b1_ref[...] + x).astype(o_ref.dtype)


@jax.jit
def shortcut_block(x_nchw, w0, b0, w1, b1):
    """out = x + conv1(relu(conv0(x))).

    x_nchw: (N, Cin, H, W) f32.  Weights in PyTorch OIHW layout:
    w0: (Cmid, Cin, 3, 3), b0: (Cmid,), w1: (Cout, Cmid, 3, 3), b1: (Cout,).
    Returns (N, Cout, H, W)."""
    N, cin, H, W = x_nchw.shape
    cmid = w0.shape[0]
    cout = w1.shape[0]
    assert cout == cin, "residual add requires out_nc == in_nc"
    P = H * W
    # Lane-dense guard: keeps every store an unmasked full-lane vst.
    # TODO(synk): pad the lane axis (and zero its mask columns) for other H*W.
    assert P % 128 == 0, "H*W must be a multiple of 128 (pad spatial otherwise)"

    # Batch folded onto the lane axis; keep >=2 grid steps when possible so
    # both v7x TensorCores get a block (neutral-ish on single-TC v5e/v6e).
    G = 2 if (N >= 2 and N % 2 == 0) else 1
    NB = N // G               # images per grid step
    L = NB * P                # lane extent per block (multiple of 128)
    cmax = max(cin, cmid)

    # One XLA-side transpose to channels-on-sublane / (batch*spatial)-on-lane.
    x = jnp.transpose(x_nchw, (1, 0, 2, 3)).reshape(cin, N * P)

    # Zero-padding masks: trace-time numpy constant, identical for every block.
    mask = jnp.asarray(_build_pad_mask(H, W, L, cmax))

    # (Cout, Cin, kh, kw) -> (Cout, kh, kw, Cin) -> (Cout, 9*Cin), bf16 for MXU.
    w0m = jnp.transpose(w0, (0, 2, 3, 1)).reshape(cmid, 9 * cin).astype(jnp.bfloat16)
    w1m = jnp.transpose(w1, (0, 2, 3, 1)).reshape(cout, 9 * cmid).astype(jnp.bfloat16)
    b0c = b0.reshape(cmid, 1).astype(jnp.float32)
    b1c = b1.reshape(cout, 1).astype(jnp.float32)

    kernel = functools.partial(_shortcut_block_kernel, W=W,
                               cin=cin, cmid=cmid, cmax=cmax)

    flops = 2 * (cmid * 9 * cin + cout * 9 * cmid) * N * P
    bytes_accessed = (x.size + cout * N * P + mask.size + b0c.size + b1c.size) * 4 \
                     + (w0m.size + w1m.size) * 2

    out = pl.pallas_call(
        kernel,
        out_shape=jax.ShapeDtypeStruct((cout, N * P), x_nchw.dtype),
        grid=(G,),
        in_specs=[
            pl.BlockSpec((cin, L), lambda g: (0, g)),
            pl.BlockSpec((9 * cmax, L), lambda g: (0, 0)),
            pl.BlockSpec((cmid, 9 * cin), lambda g: (0, 0)),
            pl.BlockSpec((cmid, 1), lambda g: (0, 0)),
            pl.BlockSpec((cout, 9 * cmid), lambda g: (0, 0)),
            pl.BlockSpec((cout, 1), lambda g: (0, 0)),
        ],
        out_specs=pl.BlockSpec((cout, L), lambda g: (0, g)),
        scratch_shapes=[pltpu.VMEM((9 * cmax, L), jnp.bfloat16)],
        compiler_params=pltpu.CompilerParams(
            dimension_semantics=("parallel",)),   # blocks are independent
        cost_estimate=pl.CostEstimate(flops=flops, transcendentals=0,
                                      bytes_accessed=bytes_accessed),
    )(x, mask, w0m, b0c, w1m, b1c)

    return jnp.transpose(out.reshape(cout, N, H, W), (1, 0, 2, 3))


def _reference(x_nchw, w0, b0, w1, b1):
    """Pure-JAX f32 reference (lax conv) mirroring the PyTorch forward."""
    x = jnp.transpose(x_nchw, (0, 2, 3, 1))                  # NCHW -> NHWC
    w0h = jnp.transpose(w0, (2, 3, 1, 0))                    # OIHW -> HWIO
    w1h = jnp.transpose(w1, (2, 3, 1, 0))
    dn = ('NHWC', 'HWIO', 'NHWC')
    fea = lax.conv_general_dilated(x, w0h, (1, 1), ((1, 1), (1, 1)),
                                   dimension_numbers=dn) + b0
    fea = jnp.maximum(fea, 0.0)
    out = lax.conv_general_dilated(fea, w1h, (1, 1), ((1, 1), (1, 1)),
                                   dimension_numbers=dn) + b1 + x
    return jnp.transpose(out, (0, 3, 1, 2))                  # NHWC -> NCHW


if __name__ == "__main__":
    key = jax.random.PRNGKey(0)
    N, in_nc, mid_nc, out_nc, H, W = 2, 8, 16, 8, 16, 16

    k1, k2, k3, k4, k5 = jax.random.split(key, 5)
    x = jax.random.normal(k1, (N, in_nc, H, W), jnp.float32)
    # deterministic synthetic parameters (PyTorch OIHW layout)
    w0 = 0.1 * jax.random.normal(k2, (mid_nc, in_nc, 3, 3), jnp.float32)
    b0 = 0.05 * jax.random.normal(k3, (mid_nc,), jnp.float32)
    w1 = 0.1 * jax.random.normal(k4, (out_nc, mid_nc, 3, 3), jnp.float32)
    b1 = 0.05 * jax.random.normal(k5, (out_nc,), jnp.float32)

    out = shortcut_block(x, w0, b0, w1, b1)
    out = jax.block_until_ready(out)

    ref_out = _reference(x, w0, b0, w1, b1)
    assert out.shape == (N, out_nc, H, W)
    # Tolerance covers the deliberate bf16 MXU operands (f32 accumulation);
    # functional errors (missing bias/residual, wrong taps/masks) are far larger.
    assert jnp.allclose(out, ref_out, atol=5e-2, rtol=5e-2), \
        float(jnp.max(jnp.abs(out - ref_out)))

    print("KERNEL_OK")
</pallas_src>

<mosaic_0001>
module attributes {stable_mosaic.version = 11 : i64} {
  func.func @_shortcut_block_kernel(%arg0: i32, %arg1: memref<8x256xf32, #tpu.memory_space<vmem>>, %arg2: memref<144x256xf32, #tpu.memory_space<vmem>>, %arg3: memref<16x72xbf16, #tpu.memory_space<vmem>>, %arg4: memref<16x1xf32, #tpu.memory_space<vmem>>, %arg5: memref<8x144xbf16, #tpu.memory_space<vmem>>, %arg6: memref<8x1xf32, #tpu.memory_space<vmem>>, %arg7: memref<8x256xf32, #tpu.memory_space<vmem>>, %arg8: memref<144x256xbf16, #tpu.memory_space<vmem>>) attributes {dimension_semantics = [#tpu.dimension_semantics<parallel>], iteration_bounds = array<i64: 2>, scalar_prefetch = 0 : i64, scratch_operands = 1 : i64, tpu.core_type = #tpu.core_type<tc>, window_params = [{transform_indices = @transform_0, window_bounds = array<i64: 8, 256>}, {pipeline_mode = #tpu.pipeline_mode<synchronous>, transform_indices = @transform_1, window_bounds = array<i64: 144, 256>}, {pipeline_mode = #tpu.pipeline_mode<synchronous>, transform_indices = @transform_2, window_bounds = array<i64: 16, 72>}, {pipeline_mode = #tpu.pipeline_mode<synchronous>, transform_indices = @transform_3, window_bounds = array<i64: 16, 1>}, {pipeline_mode = #tpu.pipeline_mode<synchronous>, transform_indices = @transform_4, window_bounds = array<i64: 8, 144>}, {pipeline_mode = #tpu.pipeline_mode<synchronous>, transform_indices = @transform_5, window_bounds = array<i64: 8, 1>}, {transform_indices = @transform_6, window_bounds = array<i64: 8, 256>}]} {
    %c0 = arith.constant 0 : index
    %c0_0 = arith.constant 0 : index
    %0 = vector.load %arg1[%c0, %c0_0] : memref<8x256xf32, #tpu.memory_space<vmem>>, vector<8x256xf32>
    %c17_i32 = arith.constant 17 : i32
    %1 = tpu.dynamic_rotate %0 by %c17_i32 dim 1 : vector<8x256xf32>, i32 -> vector<8x256xf32>
    %c0_1 = arith.constant 0 : index
    %c0_2 = arith.constant 0 : index
    %2 = vector.load %arg2[%c0_1, %c0_2] : memref<144x256xf32, #tpu.memory_space<vmem>>, vector<8x256xf32>
    %3 = arith.mulf %1, %2 : vector<8x256xf32>
    %4 = arith.truncf %3 : vector<8x256xf32> to vector<8x256xbf16>
    %c0_3 = arith.constant 0 : index
    %c0_4 = arith.constant 0 : index
    %5 = vector.load %arg8[%c0_3, %c0_4] : memref<144x256xbf16, #tpu.memory_space<vmem>>, vector<8x256xbf16>
    tpu.vector_store %arg8[%c0_3, %c0_4], %4 {strides = array<i32>} : memref<144x256xbf16, #tpu.memory_space<vmem>>, vector<8x256xbf16>,
    %c16_i32 = arith.constant 16 : i32
    %6 = tpu.dynamic_rotate %0 by %c16_i32 dim 1 : vector<8x256xf32>, i32 -> vector<8x256xf32>
    %c16 = arith.constant 16 : index
    %c0_5 = arith.constant 0 : index
    %7 = vector.load %arg2[%c16, %c0_5] : memref<144x256xf32, #tpu.memory_space<vmem>>, vector<8x256xf32>
    %8 = arith.mulf %6, %7 : vector<8x256xf32>
    %9 = arith.truncf %8 : vector<8x256xf32> to vector<8x256xbf16>
    %c8 = arith.constant 8 : index
    %c0_6 = arith.constant 0 : index
    %10 = vector.load %arg8[%c8, %c0_6] : memref<144x256xbf16, #tpu.memory_space<vmem>>, vector<8x256xbf16>
    tpu.vector_store %arg8[%c8, %c0_6], %9 {strides = array<i32>} : memref<144x256xbf16, #tpu.memory_space<vmem>>, vector<8x256xbf16>,
    %c15_i32 = arith.constant 15 : i32
    %11 = tpu.dynamic_rotate %0 by %c15_i32 dim 1 : vector<8x256xf32>, i32 -> vector<8x256xf32>
    %c32 = arith.constant 32 : index
    %c0_7 = arith.constant 0 : index
    %12 = vector.load %arg2[%c32, %c0_7] : memref<144x256xf32, #tpu.memory_space<vmem>>, vector<8x256xf32>
    %13 = arith.mulf %11, %12 : vector<8x256xf32>
    %14 = arith.truncf %13 : vector<8x256xf32> to vector<8x256xbf16>
    %c16_8 = arith.constant 16 : index
    %c0_9 = arith.constant 0 : index
    %15 = vector.load %arg8[%c16_8, %c0_9] : memref<144x256xbf16, #tpu.memory_space<vmem>>, vector<8x256xbf16>
    tpu.vector_store %arg8[%c16_8, %c0_9], %14 {strides = array<i32>} : memref<144x256xbf16, #tpu.memory_space<vmem>>, vector<8x256xbf16>,
    %c1_i32 = arith.constant 1 : i32
    %16 = tpu.dynamic_rotate %0 by %c1_i32 dim 1 : vector<8x256xf32>, i32 -> vector<8x256xf32>
    %c48 = arith.constant 48 : index
    %c0_10 = arith.constant 0 : index
    %17 = vector.load %arg2[%c48, %c0_10] : memref<144x256xf32, #tpu.memory_space<vmem>>, vector<8x256xf32>
    %18 = arith.mulf %16, %17 : vector<8x256xf32>
    %19 = arith.truncf %18 : vector<8x256xf32> to vector<8x256xbf16>
    %c24 = arith.constant 24 : index
    %c0_11 = arith.constant 0 : index
    %20 = vector.load %arg8[%c24, %c0_11] : memref<144x256xbf16, #tpu.memory_space<vmem>>, vector<8x256xbf16>
    tpu.vector_store %arg8[%c24, %c0_11], %19 {strides = array<i32>} : memref<144x256xbf16, #tpu.memory_space<vmem>>, vector<8x256xbf16>,
    %c64 = arith.constant 64 : index
    %c0_12 = arith.constant 0 : index
    %21 = vector.load %arg2[%c64, %c0_12] : memref<144x256xf32, #tpu.memory_space<vmem>>, vector<8x256xf32>
    %22 = arith.mulf %0, %21 : vector<8x256xf32>
    %23 = arith.truncf %22 : vector<8x256xf32> to vector<8x256xbf16>
    %c32_13 = arith.constant 32 : index
    %c0_14 = arith.constant 0 : index
    %24 = vector.load %arg8[%c32_13, %c0_14] : memref<144x256xbf16, #tpu.memory_space<vmem>>, vector<8x256xbf16>
    tpu.vector_store %arg8[%c32_13, %c0_14], %23 {strides = array<i32>} : memref<144x256xbf16, #tpu.memory_space<vmem>>, vector<8x256xbf16>,
    %c255_i32 = arith.constant 255 : i32
    %25 = tpu.dynamic_rotate %0 by %c255_i32 dim 1 : vector<8x256xf32>, i32 -> vector<8x256xf32>
    %c80 = arith.constant 80 : index
    %c0_15 = arith.constant 0 : index
    %26 = vector.load %arg2[%c80, %c0_15] : memref<144x256xf32, #tpu.memory_space<vmem>>, vector<8x256xf32>
    %27 = arith.mulf %25, %26 : vector<8x256xf32>
    %28 = arith.truncf %27 : vector<8x256xf32> to vector<8x256xbf16>
    %c40 = arith.constant 40 : index
    %c0_16 = arith.constant 0 : index
    %29 = vector.load %arg8[%c40, %c0_16] : memref<144x256xbf16, #tpu.memory_space<vmem>>, vector<8x256xbf16>
    tpu.vector_store %arg8[%c40, %c0_16], %28 {strides = array<i32>} : memref<144x256xbf16, #tpu.memory_space<vmem>>, vector<8x256xbf16>,
    %c241_i32 = arith.constant 241 : i32
    %30 = tpu.dynamic_rotate %0 by %c241_i32 dim 1 : vector<8x256xf32>, i32 -> vector<8x256xf32>
    %c96 = arith.constant 96 : index
    %c0_17 = arith.constant 0 : index
    %31 = vector.load %arg2[%c96, %c0_17] : memref<144x256xf32, #tpu.memory_space<vmem>>, vector<8x256xf32>
    %32 = arith.mulf %30, %31 : vector<8x256xf32>
    %33 = arith.truncf %32 : vector<8x256xf32> to vector<8x256xbf16>
    %c48_18 = arith.constant 48 : index
    %c0_19 = arith.constant 0 : index
    %34 = vector.load %arg8[%c48_18, %c0_19] : memref<144x256xbf16, #tpu.memory_space<vmem>>, vector<8x256xbf16>
    tpu.vector_store %arg8[%c48_18, %c0_19], %33 {strides = array<i32>} : memref<144x256xbf16, #tpu.memory_space<vmem>>, vector<8x256xbf16>,
    %c240_i32 = arith.constant 240 : i32
    %35 = tpu.dynamic_rotate %0 by %c240_i32 dim 1 : vector<8x256xf32>, i32 -> vector<8x256xf32>
    %c112 = arith.constant 112 : index
    %c0_20 = arith.constant 0 : index
    %36 = vector.load %arg2[%c112, %c0_20] : memref<144x256xf32, #tpu.memory_space<vmem>>, vector<8x256xf32>
    %37 = arith.mulf %35, %36 : vector<8x256xf32>
    %38 = arith.truncf %37 : vector<8x256xf32> to vector<8x256xbf16>
    %c56 = arith.constant 56 : index
    %c0_21 = arith.constant 0 : index
    %39 = vector.load %arg8[%c56, %c0_21] : memref<144x256xbf16, #tpu.memory_space<vmem>>, vector<8x256xbf16>
    tpu.vector_store %arg8[%c56, %c0_21], %38 {strides = array<i32>} : memref<144x256xbf16, #tpu.memory_space<vmem>>, vector<8x256xbf16>,
    %c239_i32 = arith.constant 239 : i32
    %40 = tpu.dynamic_rotate %0 by %c239_i32 dim 1 : vector<8x256xf32>, i32 -> vector<8x256xf32>
    %c128 = arith.constant 128 : index
    %c0_22 = arith.constant 0 : index
    %41 = vector.load %arg2[%c128, %c0_22] : memref<144x256xf32, #tpu.memory_space<vmem>>, vector<8x256xf32>
    %42 = arith.mulf %40, %41 : vector<8x256xf32>
    %43 = arith.truncf %42 : vector<8x256xf32> to vector<8x256xbf16>
    %c64_23 = arith.constant 64 : index
    %c0_24 = arith.constant 0 : index
    %44 = vector.load %arg8[%c64_23, %c0_24] : memref<144x256xbf16, #tpu.memory_space<vmem>>, vector<8x256xbf16>
    tpu.vector_store %arg8[%c64_23, %c0_24], %43 {strides = array<i32>} : memref<144x256xbf16, #tpu.memory_space<vmem>>, vector<8x256xbf16>,
    %c0_25 = arith.constant 0 : index
    %c0_26 = arith.constant 0 : index
    %45 = vector.load %arg3[%c0_25, %c0_26] : memref<16x72xbf16, #tpu.memory_space<vmem>>, vector<16x72xbf16>
    %c0_27 = arith.constant 0 : index
    %c0_28 = arith.constant 0 : index
    %46 = vector.load %arg8[%c0_27, %c0_28] : memref<144x256xbf16, #tpu.memory_space<vmem>>, vector<72x256xbf16>
    %cst = arith.constant dense<0.000000e+00> : vector<16x256xf32>
    %47 = tpu.matmul %45, %46, %cst {dimension_numbers = #tpu.dot_dimension_numbers<[1], [0], [0], [1], [0, 0, 1, 1], [], []>} : vector<16x72xbf16>, vector<72x256xbf16>, vector<16x256xf32> -> vector<16x256xf32>
    %c0_29 = arith.constant 0 : index
    %c0_30 = arith.constant 0 : index
    %48 = vector.load %arg4[%c0_29, %c0_30] : memref<16x1xf32, #tpu.memory_space<vmem>>, vector<16x1xf32>
    %49 = vector.broadcast %48 : vector<16x1xf32> to vector<16x256xf32>
    %50 = arith.addf %47, %49 : vector<16x256xf32>
    %cst_31 = arith.constant 0.000000e+00 : f32
    %51 = vector.broadcast %cst_31 : f32 to vector<16x256xf32>
    %52 = arith.maximumf %50, %51 : vector<16x256xf32>
    %c17_i32_32 = arith.constant 17 : i32
    %53 = tpu.dynamic_rotate %52 by %c17_i32_32 dim 1 : vector<16x256xf32>, i32 -> vector<16x256xf32>
    %c0_33 = arith.constant 0 : index
    %c0_34 = arith.constant 0 : index
    %54 = vector.load %arg2[%c0_33, %c0_34] : memref<144x256xf32, #tpu.memory_space<vmem>>, vector<16x256xf32>
    %55 = arith.mulf %53, %54 : vector<16x256xf32>
    %56 = arith.truncf %55 : vector<16x256xf32> to vector<16x256xbf16>
    %c0_35 = arith.constant 0 : index
    %c0_36 = arith.constant 0 : index
    %57 = vector.load %arg8[%c0_35, %c0_36] : memref<144x256xbf16, #tpu.memory_space<vmem>>, vector<16x256xbf16>
    tpu.vector_store %arg8[%c0_35, %c0_36], %56 {strides = array<i32>} : memref<144x256xbf16, #tpu.memory_space<vmem>>, vector<16x256xbf16>,
    %c16_i32_37 = arith.constant 16 : i32
    %58 = tpu.dynamic_rotate %52 by %c16_i32_37 dim 1 : vector<16x256xf32>, i32 -> vector<16x256xf32>
    %c16_38 = arith.constant 16 : index
    %c0_39 = arith.constant 0 : index
    %59 = vector.load %arg2[%c16_38, %c0_39] : memref<144x256xf32, #tpu.memory_space<vmem>>, vector<16x256xf32>
    %60 = arith.mulf %58, %59 : vector<16x256xf32>
    %61 = arith.truncf %60 : vector<16x256xf32> to vector<16x256xbf16>
    %c16_40 = arith.constant 16 : index
    %c0_41 = arith.constant 0 : index
    %62 = vector.load %arg8[%c16_40, %c0_41] : memref<144x256xbf16, #tpu.memory_space<vmem>>, vector<16x256xbf16>
    tpu.vector_store %arg8[%c16_40, %c0_41], %61 {strides = array<i32>} : memref<144x256xbf16, #tpu.memory_space<vmem>>, vector<16x256xbf16>,
    %c15_i32_42 = arith.constant 15 : i32
    %63 = tpu.dynamic_rotate %52 by %c15_i32_42 dim 1 : vector<16x256xf32>, i32 -> vector<16x256xf32>
    %c32_43 = arith.constant 32 : index
    %c0_44 = arith.constant 0 : index
    %64 = vector.load %arg2[%c32_43, %c0_44] : memref<144x256xf32, #tpu.memory_space<vmem>>, vector<16x256xf32>
    %65 = arith.mulf %63, %64 : vector<16x256xf32>
    %66 = arith.truncf %65 : vector<16x256xf32> to vector<16x256xbf16>
    %c32_45 = arith.constant 32 : index
    %c0_46 = arith.constant 0 : index
    %67 = vector.load %arg8[%c32_45, %c0_46] : memref<144x256xbf16, #tpu.memory_space<vmem>>, vector<16x256xbf16>
    tpu.vector_store %arg8[%c32_45, %c0_46], %66 {strides = array<i32>} : memref<144x256xbf16, #tpu.memory_space<vmem>>, vector<16x256xbf16>,
    %c1_i32_47 = arith.constant 1 : i32
    %68 = tpu.dynamic_rotate %52 by %c1_i32_47 dim 1 : vector<16x256xf32>, i32 -> vector<16x256xf32>
    %c48_48 = arith.constant 48 : index
    %c0_49 = arith.constant 0 : index
    %69 = vector.load %arg2[%c48_48, %c0_49] : memref<144x256xf32, #tpu.memory_space<vmem>>, vector<16x256xf32>
    %70 = arith.mulf %68, %69 : vector<16x256xf32>
    %71 = arith.truncf %70 : vector<16x256xf32> to vector<16x256xbf16>
    %c48_50 = arith.constant 48 : index
    %c0_51 = arith.constant 0 : index
    %72 = vector.load %arg8[%c48_50, %c0_51] : memref<144x256xbf16, #tpu.memory_space<vmem>>, vector<16x256xbf16>
    tpu.vector_store %arg8[%c48_50, %c0_51], %71 {strides = array<i32>} : memref<144x256xbf16, #tpu.memory_space<vmem>>, vector<16x256xbf16>,
    %c64_52 = arith.constant 64 : index
    %c0_53 = arith.constant 0 : index
    %73 = vector.load %arg2[%c64_52, %c0_53] : memref<144x256xf32, #tpu.memory_space<vmem>>, vector<16x256xf32>
    %74 = arith.mulf %52, %73 : vector<16x256xf32>
    %75 = arith.truncf %74 : vector<16x256xf32> to vector<16x256xbf16>
    %c64_54 = arith.constant 64 : index
    %c0_55 = arith.constant 0 : index
    %76 = vector.load %arg8[%c64_54, %c0_55] : memref<144x256xbf16, #tpu.memory_space<vmem>>, vector<16x256xbf16>
    tpu.vector_store %arg8[%c64_54, %c0_55], %75 {strides = array<i32>} : memref<144x256xbf16, #tpu.memory_space<vmem>>, vector<16x256xbf16>,
    %c255_i32_56 = arith.constant 255 : i32
    %77 = tpu.dynamic_rotate %52 by %c255_i32_56 dim 1 : vector<16x256xf32>, i32 -> vector<16x256xf32>
    %c80_57 = arith.constant 80 : index
    %c0_58 = arith.constant 0 : index
    %78 = vector.load %arg2[%c80_57, %c0_58] : memref<144x256xf32, #tpu.memory_space<vmem>>, vector<16x256xf32>
    %79 = arith.mulf %77, %78 : vector<16x256xf32>
    %80 = arith.truncf %79 : vector<16x256xf32> to vector<16x256xbf16>
    %c80_59 = arith.constant 80 : index
    %c0_60 = arith.constant 0 : index
    %81 = vector.load %arg8[%c80_59, %c0_60] : memref<144x256xbf16, #tpu.memory_space<vmem>>, vector<16x256xbf16>
    tpu.vector_store %arg8[%c80_59, %c0_60], %80 {strides = array<i32>} : memref<144x256xbf16, #tpu.memory_space<vmem>>, vector<16x256xbf16>,
    %c241_i32_61 = arith.constant 241 : i32
    %82 = tpu.dynamic_rotate %52 by %c241_i32_61 dim 1 : vector<16x256xf32>, i32 -> vector<16x256xf32>
    %c96_62 = arith.constant 96 : index
    %c0_63 = arith.constant 0 : index
    %83 = vector.load %arg2[%c96_62, %c0_63] : memref<144x256xf32, #tpu.memory_space<vmem>>, vector<16x256xf32>
    %84 = arith.mulf %82, %83 : vector<16x256xf32>
    %85 = arith.truncf %84 : vector<16x256xf32> to vector<16x256xbf16>
    %c96_64 = arith.constant 96 : index
    %c0_65 = arith.constant 0 : index
    %86 = vector.load %arg8[%c96_64, %c0_65] : memref<144x256xbf16, #tpu.memory_space<vmem>>, vector<16x256xbf16>
    tpu.vector_store %arg8[%c96_64, %c0_65], %85 {strides = array<i32>} : memref<144x256xbf16, #tpu.memory_space<vmem>>, vector<16x256xbf16>,
    %c240_i32_66 = arith.constant 240 : i32
    %87 = tpu.dynamic_rotate %52 by %c240_i32_66 dim 1 : vector<16x256xf32>, i32 -> vector<16x256xf32>
    %c112_67 = arith.constant 112 : index
    %c0_68 = arith.constant 0 : index
    %88 = vector.load %arg2[%c112_67, %c0_68] : memref<144x256xf32, #tpu.memory_space<vmem>>, vector<16x256xf32>
    %89 = arith.mulf %87, %88 : vector<16x256xf32>
    %90 = arith.truncf %89 : vector<16x256xf32> to vector<16x256xbf16>
    %c112_69 = arith.constant 112 : index
    %c0_70 = arith.constant 0 : index
    %91 = vector.load %arg8[%c112_69, %c0_70] : memref<144x256xbf16, #tpu.memory_space<vmem>>, vector<16x256xbf16>
    tpu.vector_store %arg8[%c112_69, %c0_70], %90 {strides = array<i32>} : memref<144x256xbf16, #tpu.memory_space<vmem>>, vector<16x256xbf16>,
    %c239_i32_71 = arith.constant 239 : i32
    %92 = tpu.dynamic_rotate %52 by %c239_i32_71 dim 1 : vector<16x256xf32>, i32 -> vector<16x256xf32>
    %c128_72 = arith.constant 128 : index
    %c0_73 = arith.constant 0 : index
    %93 = vector.load %arg2[%c128_72, %c0_73] : memref<144x256xf32, #tpu.memory_space<vmem>>, vector<16x256xf32>
    %94 = arith.mulf %92, %93 : vector<16x256xf32>
    %95 = arith.truncf %94 : vector<16x256xf32> to vector<16x256xbf16>
    %c128_74 = arith.constant 128 : index
    %c0_75 = arith.constant 0 : index
    %96 = vector.load %arg8[%c128_74, %c0_75] : memref<144x256xbf16, #tpu.memory_space<vmem>>, vector<16x256xbf16>
    tpu.vector_store %arg8[%c128_74, %c0_75], %95 {strides = array<i32>} : memref<144x256xbf16, #tpu.memory_space<vmem>>, vector<16x256xbf16>,
    %c0_76 = arith.constant 0 : index
    %c0_77 = arith.constant 0 : index
    %97 = vector.load %arg5[%c0_76, %c0_77] : memref<8x144xbf16, #tpu.memory_space<vmem>>, vector<8x144xbf16>
    %c0_78 = arith.constant 0 : index
    %c0_79 = arith.constant 0 : index
    %98 = vector.load %arg8[%c0_78, %c0_79] : memref<144x256xbf16, #tpu.memory_space<vmem>>, vector<144x256xbf16>
    %cst_80 = arith.constant dense<0.000000e+00> : vector<8x256xf32>
    %99 = tpu.matmul %97, %98, %cst_80 {dimension_numbers = #tpu.dot_dimension_numbers<[1], [0], [0], [1], [0, 0, 1, 1], [], []>} : vector<8x144xbf16>, vector<144x256xbf16>, vector<8x256xf32> -> vector<8x256xf32>
    %c0_81 = arith.constant 0 : index
    %c0_82 = arith.constant 0 : index
    %100 = vector.load %arg6[%c0_81, %c0_82] : memref<8x1xf32, #tpu.memory_space<vmem>>, vector<8x1xf32>
    %101 = vector.broadcast %100 : vector<8x1xf32> to vector<8x256xf32>
    %102 = arith.addf %99, %101 : vector<8x256xf32>
    %103 = arith.addf %102, %0 : vector<8x256xf32>
    %c0_83 = arith.constant 0 : index
    %c0_84 = arith.constant 0 : index
    %104 = vector.load %arg7[%c0_83, %c0_84] : memref<8x256xf32, #tpu.memory_space<vmem>>, vector<8x256xf32>
    tpu.vector_store %arg7[%c0_83, %c0_84], %103 {strides = array<i32>} : memref<8x256xf32, #tpu.memory_space<vmem>>, vector<8x256xf32>,
    return
  }
  func.func @transform_0(%arg0: i32) -> (i32, i32) {
    %c0_i32 = arith.constant 0 : i32
    %c0_i32_0 = arith.constant 0 : i32
    return %c0_i32, %arg0 : i32, i32
  }
  func.func @transform_1(%arg0: i32) -> (i32, i32) {
    %c0_i32 = arith.constant 0 : i32
    %c0_i32_0 = arith.constant 0 : i32
    %c0_i32_1 = arith.constant 0 : i32
    return %c0_i32, %c0_i32_0 : i32, i32
  }
  func.func @transform_2(%arg0: i32) -> (i32, i32) {
    %c0_i32 = arith.constant 0 : i32
    %c0_i32_0 = arith.constant 0 : i32
    %c0_i32_1 = arith.constant 0 : i32
    return %c0_i32, %c0_i32_0 : i32, i32
  }
  func.func @transform_3(%arg0: i32) -> (i32, i32) {
    %c0_i32 = arith.constant 0 : i32
    %c0_i32_0 = arith.constant 0 : i32
    %c0_i32_1 = arith.constant 0 : i32
    return %c0_i32, %c0_i32_0 : i32, i32
  }
  func.func @transform_4(%arg0: i32) -> (i32, i32) {
    %c0_i32 = arith.constant 0 : i32
    %c0_i32_0 = arith.constant 0 : i32
    %c0_i32_1 = arith.constant 0 : i32
    return %c0_i32, %c0_i32_0 : i32, i32
  }
  func.func @transform_5(%arg0: i32) -> (i32, i32) {
    %c0_i32 = arith.constant 0 : i32
    %c0_i32_0 = arith.constant 0 : i32
    %c0_i32_1 = arith.constant 0 : i32
    return %c0_i32, %c0_i32_0 : i32, i32
  }
  func.func @transform_6(%arg0: i32) -> (i32, i32) {
    %c0_i32 = arith.constant 0 : i32
    %c0_i32_0 = arith.constant 0 : i32
    return %c0_i32, %arg0 : i32, i32
  }
}

</mosaic_0001>

<bundles_post_ra>
// kernel: shortcut_block.1
= control target key start
LH: loop header
LB: loop body
LE: loop exit
PB: predicated region body
PF: predicated region fallthrough
CT: control target
= control target key end

     0   :  { %s930_s21 = smov 0   ;;  %s1369_s0 = inlined_call_operand.vmem [shape: f32[8,512], index: 0, kind: input, shape index: {}]   ;;  %s1370_s1 = inlined_call_operand.vmem [shape: f32[144,256], index: 1, kind: input, shape index: {}]   ;;  %s1371_s2 = inlined_call_operand.vmem [shape: bf16[16,72], index: 2, kind: input, shape index: {}]   ;;  %s1372_s3 = inlined_call_operand.vmem [shape: f32[16,1], index: 3, kind: input, shape index: {}]   ;;  %s1373_s4 = inlined_call_operand.vmem [shape: bf16[8,144], index: 4, kind: input, shape index: {}]   ;;  %s1374_s5 = inlined_call_operand.vmem [shape: f32[8,1], index: 5, kind: input, shape index: {}]   ;;  %s1375_s6 = inlined_call_operand.vmem [shape: f32[8,512], index: 6, kind: output, shape index: {}]  }
   0x1 LB: > { %s839_s22 = sadd.s32 4294967295, %s884_s21   ;;  %p843_p0 = scmp.ge.s32.totalorder %s884_s21, 1  ;;  %s884_s21 = sphi %s930_s21, %s16_s21  }
   0x2   : > { %p213_p1 = scmp.lt.s32.totalorder %s884_s21, 3 }
   0x4   : > { %p214_p2 = pnand %p843_p0, %p213_p1 }
   0x5   : > { %s844_s23 = sshll.u32 (!%p214_p2), %s839_s22, 1  ;;  %s886_s28 = smov (!%p214_p2), 17   ;;  %v961_v2 = vld [vmem:[%s1370_s1 + $0x88] sm:$0xff] (!%p214_p2)  ;;  %v966_v3 = vld [vmem:[%s1370_s1 + $0x80] sm:$0xff] (!%p214_p2)  ;;  %v894_v8 = vmov (!%p214_p2), 0   ;;  %v262_v11 = vlaneseq (!%p214_p2)  ;;  %vm445_vm8 = vcmask (!%p214_p2), 1043456  }
   0x6   : > { %217 = sbr.rel (%p214_p2) target bundleno = 797 (0x31d), region = 44  ;;  %p244_p3 = scmp.lt.s32.totalorder (!%p214_p2), %s844_s23, 3  ;;  %484 = vmatprep.mubr.bf16.mxu0 (!%p214_p2), %v894_v8  ;;  %873 = vset.pattern.permute.xlu0 (!%p214_p2), %v894_v8  ;;  %v424_v9 = vld [vmem:[%s1372_s3] sm:$0xff] (!%p214_p2)  ;;  %v425_v10 = vld [vmem:[%s1372_s3 + $0x8] sm:$0xff] (!%p214_p2)  ;;  %vm441_vm9 = vcmask (!%p214_p2), 588800   ;;  %vm734_vm10 = vcmask (!%p214_p2), 130048  }
   0x7   : > { %s887_s29 = smov (!%p214_p2), 16   ;;  %s888_s10 = smov (!%p214_p2), 1   ;;  %874 = vset.pattern.permute.xlu1 (!%p214_p2), %v894_v8  ;;  %v1002_v12 = vand.u32 (!%p214_p2), 127, %v262_v11  ;;  %v1008_v15 = vld [vmem:[%s1370_s1] sm:$0xff] (!%p214_p2)  ;;  %v1014_v16 = vld [vmem:[%s1370_s1 + $0x8] sm:$0xff] (!%p214_p2) }
   0x8   : > { %s889_s11 = smov (!%p214_p2), 15   ;;  %s890_s12 = smov (!%p214_p2), 127   ;;  %v1019_v17 = vld [vmem:[%s1370_s1 + $0x20] sm:$0xff] (!%p214_p2)  ;;  %v1024_v18 = vld [vmem:[%s1370_s1 + $0x28] sm:$0xff] (!%p214_p2) }
   0x9   : > { %s891_s13 = smov (!%p214_p2), 112   ;;  %s892_s14 = smov (!%p214_p2), 113   ;;  %vm264_vm0 = vcmp.lt.s32.totalorder (!%p214_p2), %v1002_v12, 17  ;;  %vm279_vm1 = vcmp.lt.s32.totalorder (!%p214_p2), %v1002_v12, 16  ;;  %vm315_vm2 = vcmp.lt.s32.totalorder (!%p214_p2), %v1002_v12, 1  ;;  %v1042_v29 = vld [vmem:[%s1370_s1 + $0x60] sm:$0xff] (!%p214_p2) }
   0xa   : > { %s893_s15 = smov (!%p214_p2), 111   ;;  %v1047_v30 = vld [vmem:[%s1370_s1 + $0x68] sm:$0xff] (!%p214_p2)  ;;  %vm300_vm3 = vcmp.lt.s32.totalorder (!%p214_p2), %v1002_v12, 15  ;;  %v1059_v43 = vld [vmem:[%s1370_s1 + $0x40] sm:$0xff] (!%p214_p2)  ;;  %vm344_vm4 = vcmp.lt.s32.totalorder (!%p214_p2), %v1002_v12, 127  ;;  %vm380_vm5 = vcmp.lt.s32.totalorder (!%p214_p2), %v1002_v12, 112 }
   0xb   : > { %v1064_v44 = vld [vmem:[%s1370_s1 + $0x48] sm:$0xff] (!%p214_p2)  ;;  %v1076_v55 = vld [vmem:[%s1370_s1 + $0xa0] sm:$0xff] (!%p214_p2)  ;;  %vm365_vm6 = vcmp.lt.s32.totalorder (!%p214_p2), %v1002_v12, 113  ;;  %vm401_vm7 = vcmp.lt.s32.totalorder (!%p214_p2), %v1002_v12, 111 }
   0xc   : > { %v1081_v56 = vld [vmem:[%s1370_s1 + $0xa8] sm:$0xff] (!%p214_p2) }
   0xd   : > { %s1377_s23 = smov (!%p244_p3, %s844_s23), 3 }
   0xe   : > { %s845_s24 = sshll.u32 %s1377_s23, 3 }
   0xf   : > { %s247_s27 = scalar_lea.vmem %s1369_s0, %s845_s24  ;;  %s253_s9 = scalar_lea.vmem %s1375_s6, %s845_s24 }
  0x10   : > { %v946_v0 = vld [vmem:[%s247_s27] sm:$0xff]  ;;  %v952_v1 = vld [vmem:[%s247_s27 + $0x8] sm:$0xff] }
  0x11   : > { %258 = vrot.lane.b32.xlu1 %v946_v0, %s886_s28  ;;  %275 = vrot.lane.b32.xlu0 %v946_v0, %s887_s29  ;;  %v335_v4 = vmul.f32 %v961_v2, %v952_v1  ;;  %v334_v5 = vmul.f32 %v966_v3, %v946_v0 }
  0x13   : > { %v337_v6 = vpack.c.bf16 %v335_v4, %v335_v4  ;;  %v336_v7 = vpack.c.bf16 %v334_v5, %v334_v5  ;;  %v1093_v5 = vld [vmem:[%s1370_s1 + $0xe0] sm:$0xff] }
  0x15   : > { %260 = vrot.lane.b32.xlu1 %v952_v1, %s886_s28  ;;  %277 = vrot.lane.b32.xlu0 %v952_v1, %s887_s29  ;;  %339 = vst [vmem:[#allocation2 + $0x28] sm:$0xf] %v337_v6  ;;  %338 = vst [vmem:[#allocation2 + $0x20] sm:$0xf] %v336_v7  ;;  %v1098_v7 = vld [vmem:[%s1370_s1 + $0xe8] sm:$0xff] }
  0x19   : > { %313 = vrot.lane.b32.xlu1 %v952_v1, %s888_s10  ;;  %311 = vrot.lane.b32.xlu0 %v946_v0, %s888_s10 }
  0x1d   : > { %298 = vrot.lane.b32.xlu1 %v952_v1, %s889_s11  ;;  %296 = vrot.lane.b32.xlu0 %v946_v0, %s889_s11 }
  0x21   : > { %342 = vrot.lane.b32.xlu1 %v952_v1, %s890_s12  ;;  %340 = vrot.lane.b32.xlu0 %v946_v0, %s890_s12 }
  0x25   : > { %378 = vrot.lane.b32.xlu1 %v952_v1, %s891_s13  ;;  %376 = vrot.lane.b32.xlu0 %v946_v0, %s891_s13 }
  0x29   : > { %363 = vrot.lane.b32.xlu1 %v952_v1, %s892_s14  ;;  %361 = vrot.lane.b32.xlu0 %v946_v0, %s892_s14 }
  0x2d   : > { %399 = vrot.lane.b32.xlu1 %v952_v1, %s893_s15  ;;  %397 = vrot.lane.b32.xlu0 %v946_v0, %s893_s15 }
  0x31   : > { %428 = vperm.xlu0 %873, %v424_v9   ;;  %433 = vperm.xlu1 %874, %v425_v10  }
  0x83   : > { %v259_v13 = vpop.permute.xlu1 %258  ;;  %v276_v14 = vpop.permute.xlu0 %275 }
  0x87   : > { %v261_v19 = vpop.permute.xlu1 %260  ;;  %v278_v20 = vpop.permute.xlu0 %277 }
  0x88   : > { %v265_v21 = vsel %vm264_vm0, %v259_v13, %v261_v19  ;;  %v266_v22 = vsel %vm264_vm0, %v261_v19, %v259_v13  ;;  %v280_v23 = vsel %vm279_vm1, %v276_v14, %v278_v20  ;;  %v281_v24 = vsel %vm279_vm1, %v278_v20, %v276_v14 }
  0x89   : > { %v269_v25 = vmul.f32 %v1008_v15, %v266_v22  ;;  %v270_v26 = vmul.f32 %v1014_v16, %v265_v21  ;;  %v284_v27 = vmul.f32 %v1019_v17, %v281_v24  ;;  %v285_v28 = vmul.f32 %v1024_v18, %v280_v23  ;;  %v1110_v24 = vld [vmem:[%s1370_s1 + $0xc0] sm:$0xff] }
  0x8b   : > { %v271_v31 = vpack.c.bf16 %v269_v25, %v269_v25  ;;  %v272_v32 = vpack.c.bf16 %v270_v26, %v270_v26  ;;  %v286_v33 = vpack.c.bf16 %v284_v27, %v284_v27  ;;  %v287_v34 = vpack.c.bf16 %v285_v28, %v285_v28  ;;  %v314_v35 = vpop.permute.xlu1 %313  ;;  %v312_v36 = vpop.permute.xlu0 %311  ;;  %v1115_v25 = vld [vmem:[%s1370_s1 + $0xc8] sm:$0xff] }
  0x8c   : > { %v316_v37 = vsel %vm315_vm2, %v312_v36, %v314_v35  ;;  %v317_v38 = vsel %vm315_vm2, %v314_v35, %v312_v36 }
  0x8d   : > { %273 = vst [vmem:[#allocation2] sm:$0xf] %v271_v31  ;;  %274 = vst [vmem:[#allocation2 + $0x8] sm:$0xf] %v272_v32  ;;  %v290_v39 = vrot.slane %v286_v33, 4  ;;  %v291_v40 = vrot.slane %v287_v34, 4  ;;  %v320_v41 = vmul.f32 %v1042_v29, %v317_v38  ;;  %v321_v42 = vmul.f32 %v1047_v30, %v316_v37 }
  0x8f   : > { %294 = vst [vmem:[#allocation2] sm:$0xf0] %v290_v39  ;;  %295 = vst [vmem:[#allocation2 + $0x8] sm:$0xf0] %v291_v40  ;;  %v322_v45 = vpack.c.bf16 %v320_v41, %v320_v41  ;;  %v323_v46 = vpack.c.bf16 %v321_v42, %v321_v42  ;;  %v299_v47 = vpop.permute.xlu1 %298  ;;  %v297_v48 = vpop.permute.xlu0 %296  ;;  %v1127_v40 = vld [vmem:[%s1370_s1 + $0x100] sm:$0xff]  ;;  %v1132_v41 = vld [vmem:[%s1370_s1 + $0x108] sm:$0xff] }
  0x90   : > { %v301_v49 = vsel %vm300_vm3, %v297_v48, %v299_v47  ;;  %v302_v50 = vsel %vm300_vm3, %v299_v47, %v297_v48 }
  0x91   : > { %v326_v51 = vrot.slane %v322_v45, 4  ;;  %v327_v52 = vrot.slane %v323_v46, 4  ;;  %v305_v53 = vmul.f32 %v1059_v43, %v302_v50  ;;  %v306_v54 = vmul.f32 %v1064_v44, %v301_v49 }
  0x93   : > { %330 = vst [vmem:[#allocation2 + $0x10] sm:$0xf0] %v326_v51  ;;  %331 = vst [vmem:[#allocation2 + $0x18] sm:$0xf0] %v327_v52  ;;  %v307_v57 = vpack.c.bf16 %v305_v53, %v305_v53  ;;  %v308_v58 = vpack.c.bf16 %v306_v54, %v306_v54  ;;  %v343_v59 = vpop.permute.xlu1 %342  ;;  %v341_v60 = vpop.permute.xlu0 %340 }
  0x94   : > { %v345_v61 = vsel %vm344_vm4, %v341_v60, %v343_v59  ;;  %v346_v62 = vsel %vm344_vm4, %v343_v59, %v341_v60 }
  0x95   : > { %309 = vst [vmem:[#allocation2 + $0x10] sm:$0xf] %v307_v57  ;;  %310 = vst [vmem:[#allocation2 + $0x18] sm:$0xf] %v308_v58  ;;  %v349_v63 = vmul.f32 %v1076_v55, %v345_v61  ;;  %v350_v4 = vmul.f32 %v1081_v56, %v346_v62 }
  0x96   : > { %v415_v6 = vld [vmem:[#allocation2 + $0x8] sm:$0xff]  ;;  %v414_v8 = vld [vmem:[#allocation2] sm:$0xff] }
  0x97   : > { %v351_v9 = vpack.c.bf16 %v349_v63, %v349_v63  ;;  %v352_v10 = vpack.c.bf16 %v350_v4, %v350_v4  ;;  %v379_v11 = vpop.permute.xlu1 %378  ;;  %452 = vmatprep.subr.bf16.mxu0 %v415_v6  ;;  %v377_v13 = vpop.permute.xlu0 %376  ;;  %v875_v63 = vld [vmem:[%s1371_s2] sm:$0xff]  }
  0x98   : > { %v381_v14 = vsel %vm380_vm5, %v377_v13, %v379_v11  ;;  %v382_v19 = vsel %vm380_vm5, %v379_v11, %v377_v13  ;;  %453 = vmatpush1.bf16.msra.mxu0 %v414_v8 }
  0x99   : > { %v355_v20 = vrot.slane %v351_v9, 4  ;;  %v356_v21 = vrot.slane %v352_v10, 4  ;;  %v385_v22 = vmul.f32 %v1093_v5, %v381_v14  ;;  %v386_v23 = vmul.f32 %v1098_v7, %v382_v19 }
  0x9b   : > { %359 = vst [vmem:[#allocation2 + $0x20] sm:$0xf0] %v355_v20  ;;  %360 = vst [vmem:[#allocation2 + $0x28] sm:$0xf0] %v356_v21  ;;  %v387_v26 = vpack.c.bf16 %v385_v22, %v385_v22  ;;  %v388_v27 = vpack.c.bf16 %v386_v23, %v386_v23  ;;  %v364_v28 = vpop.permute.xlu1 %363  ;;  %v362_v31 = vpop.permute.xlu0 %361  ;;  %v597_v23 = vld [vmem:[%s1370_s1 + $0x90] sm:$0xff] }
  0x9c   : > { %v366_v32 = vsel %vm365_vm6, %v362_v31, %v364_v28  ;;  %v367_v33 = vsel %vm365_vm6, %v364_v28, %v362_v31  ;;  %v417_v34 = vld [vmem:[#allocation2 + $0x18] sm:$0xff]  ;;  %v416_v35 = vld [vmem:[#allocation2 + $0x10] sm:$0xff] }
  0x9d   : > { %v391_v36 = vrot.slane %v387_v26, 4  ;;  %v392_v37 = vrot.slane %v388_v27, 4  ;;  %v370_v38 = vmul.f32 %v1110_v24, %v366_v32  ;;  %v371_v39 = vmul.f32 %v1115_v25, %v367_v33  ;;  %454 = vmatprep.subr.bf16.mxu0 %v417_v34  ;;  %v598_v27 = vld [vmem:[%s1370_s1 + $0x98] sm:$0xff] }
  0x9e   : > { %455 = vmatpush1.bf16.msra.mxu0 %v416_v35 }
  0x9f   : > { %395 = vst [vmem:[#allocation2 + $0x30] sm:$0xf0] %v391_v36  ;;  %396 = vst [vmem:[#allocation2 + $0x38] sm:$0xf0] %v392_v37  ;;  %v372_v42 = vpack.c.bf16 %v370_v38, %v370_v38  ;;  %v373_v45 = vpack.c.bf16 %v371_v39, %v371_v39  ;;  %v400_v46 = vpop.permute.xlu1 %399  ;;  %v398_v47 = vpop.permute.xlu0 %397  ;;  %v722_v37 = vld [vmem:[%s1374_s5] sm:$0xff] }
  0xa0   : > { %v402_v48 = vsel %vm401_vm7, %v398_v47, %v400_v46  ;;  %v403_v49 = vsel %vm401_vm7, %v400_v46, %v398_v47 }
  0xa1   : > { %374 = vst [vmem:[#allocation2 + $0x30] sm:$0xf] %v372_v42  ;;  %375 = vst [vmem:[#allocation2 + $0x38] sm:$0xf] %v373_v45  ;;  %v406_v50 = vmul.f32 %v1127_v40, %v402_v48  ;;  %v407_v51 = vmul.f32 %v1132_v41, %v403_v49 }
  0xa2   : > { %v419_v52 = vld [vmem:[#allocation2 + $0x28] sm:$0xff]  ;;  %v418_v53 = vld [vmem:[#allocation2 + $0x20] sm:$0xff] }
  0xa3   : > { %v408_v54 = vpack.c.bf16 %v406_v50, %v406_v50  ;;  %v409_v57 = vpack.c.bf16 %v407_v51, %v407_v51  ;;  %456 = vmatprep.subr.bf16.mxu0 %v419_v52 }
  0xa4   : > { %457 = vmatpush1.bf16.msra.mxu0 %v418_v53 }
  0xa5   : > { %410 = vst [vmem:[#allocation2 + $0x40] sm:$0xf] %v408_v54  ;;  %411 = vst [vmem:[#allocation2 + $0x48] sm:$0xf] %v409_v57 }
  0xa8   : > { %v421_v58 = vld [vmem:[#allocation2 + $0x38] sm:$0xff]  ;;  %v420_v59 = vld [vmem:[#allocation2 + $0x30] sm:$0xff] }
  0xa9   : > { %458 = vmatprep.subr.bf16.mxu0 %v421_v58 }
  0xaa   : > { %459 = vmatpush1.bf16.msra.mxu0 %v420_v59 }
  0xac   : > { %v423_v60 = vld [vmem:[#allocation2 + $0x48] sm:$0xf]  ;;  %v422_v61 = vld [vmem:[#allocation2 + $0x40] sm:$0xf] }
  0xad   : > { %849 = vmatprep.subr.msk.bf16.mxu0 %vm445_vm8, %v423_v60  ;;  %v447_v62 = vsel %vm445_vm8, %v422_v61, 0  ;;  %v513_v61 = vld [vmem:[%s1370_s1 + $0x10] sm:$0xff] }
  0xae   : > { %461 = vmatpush1.bf16.msra.mxu0 %v447_v62  ;;  %v514_v62 = vld [vmem:[%s1370_s1 + $0x18] sm:$0xff] }
  0xb0   : > { %v429_v4 = vpop.permute.xlu0 %428  ;;  %v434_v8 = vpop.permute.xlu1 %433 }
  0xb1   : > { %850 = vmatmul.mubr.msk.bf16.vlgmr.msra.gmra.mrb[0].mxu0 %vm441_vm9, %v875_v63 }
 0x184   : > { %v486_v6 = vpop.f32.mrb[0].mxu0 }
 0x185   : > { %v487_v9 = vadd.f32 %v486_v6, %v429_v4  ;;  %v488_v10 = vpop.f32.mrb[1].mxu0 }
 0x186   : > { %v489_v11 = vadd.f32 %v488_v10, %v429_v4  ;;  %v490_v13 = vpop.f32.mrb[2].mxu0 }
 0x187   : > { %v495_v14 = vmax.f32 %v487_v9, 0.0  ;;  %v491_v19 = vadd.f32 %v490_v13, %v434_v8  ;;  %v492_v20 = vpop.f32.mrb[3].mxu0 }
 0x188   : > { %v496_v21 = vmax.f32 %v489_v11, 0.0  ;;  %v493_v22 = vadd.f32 %v492_v20, %v434_v8  ;;  %v537_v20 = vld [vmem:[%s1370_s1 + $0x30] sm:$0xff] }
 0x189   : > { %v497_v26 = vmax.f32 %v491_v19, 0.0  ;;  %499 = vrot.lane.b32.xlu1 %v495_v14, %s886_s28  ;;  %v599_v31 = vmul.f32 %v495_v14, %v966_v3 }
 0x18a   : > { %v498_v28 = vmax.f32 %v493_v22, 0.0  ;;  %v600_v33 = vmul.f32 %v496_v21, %v961_v2  ;;  %v1188_v2 = vld [vmem:[%s1373_s4] sm:$0xff] }
 0x18b   : > { %501 = vrot.lane.b32.xlu0 %v497_v26, %s886_s28  ;;  %v601_v32 = vmul.f32 %v597_v23, %v497_v26  ;;  %v852_v3 = vcombine.high %v1188_v2, %v1188_v2 }
 0x18c   : > { %v602_v34 = vmul.f32 %v598_v27, %v498_v28 }
 0x18d   : > { %523 = vrot.lane.b32.xlu1 %v495_v14, %s887_s29  ;;  %v1154_v35 = vpack.c.bf16 %v601_v32, %v599_v31  ;;  %853 = vmatprep.mubr.msk.bf16.mxu1 %vm734_vm10, %v852_v3 }
 0x18e   : > { %v1156_v36 = vpack.c.bf16 %v602_v34, %v600_v33 }
 0x18f   : > { %525 = vrot.lane.b32.xlu0 %v497_v26, %s887_s29  ;;  %605 = vst [vmem:[#allocation2 + $0x40] sm:$0xff] %v1154_v35 }
 0x190   : > { %606 = vst [vmem:[#allocation2 + $0x48] sm:$0xff] %v1156_v36 }
 0x191   : > { %547 = vrot.lane.b32.xlu1 %v495_v14, %s889_s11 }
 0x193   : > { %549 = vrot.lane.b32.xlu0 %v497_v26, %s889_s11 }
 0x195   : > { %571 = vrot.lane.b32.xlu1 %v495_v14, %s888_s10 }
 0x197   : > { %573 = vrot.lane.b32.xlu0 %v497_v26, %s888_s10 }
 0x199   : > { %607 = vrot.lane.b32.xlu1 %v495_v14, %s890_s12 }
 0x19b   : > { %609 = vrot.lane.b32.xlu0 %v497_v26, %s890_s12 }
 0x19d   : > { %631 = vrot.lane.b32.xlu1 %v495_v14, %s892_s14 }
 0x19f   : > { %633 = vrot.lane.b32.xlu0 %v497_v26, %s892_s14 }
 0x1a1   : > { %655 = vrot.lane.b32.xlu1 %v495_v14, %s891_s13 }
 0x1a3   : > { %657 = vrot.lane.b32.xlu0 %v497_v26, %s891_s13 }
 0x1a5   : > { %503 = vrot.lane.b32.xlu1 %v496_v21, %s886_s28 }
 0x1a7   : > { %505 = vrot.lane.b32.xlu0 %v498_v28, %s886_s28 }
 0x1a9   : > { %527 = vrot.lane.b32.xlu1 %v496_v21, %s887_s29 }
 0x1ab   : > { %529 = vrot.lane.b32.xlu0 %v498_v28, %s887_s29 }
 0x1ad   : > { %551 = vrot.lane.b32.xlu1 %v496_v21, %s889_s11 }
 0x1af   : > { %553 = vrot.lane.b32.xlu0 %v498_v28, %s889_s11 }
 0x1b1   : > { %575 = vrot.lane.b32.xlu1 %v496_v21, %s888_s10 }
 0x1b3   : > { %577 = vrot.lane.b32.xlu0 %v498_v28, %s888_s10 }
 0x1b5   : > { %679 = vrot.lane.b32.xlu1 %v495_v14, %s893_s15 }
 0x1b7   : > { %681 = vrot.lane.b32.xlu0 %v497_v26, %s893_s15 }
 0x1b9   : > { %611 = vrot.lane.b32.xlu1 %v496_v21, %s890_s12 }
 0x1bb   : > { %613 = vrot.lane.b32.xlu0 %v498_v28, %s890_s12 }
 0x1bd   : > { %635 = vrot.lane.b32.xlu1 %v496_v21, %s892_s14 }
 0x1bf   : > { %637 = vrot.lane.b32.xlu0 %v498_v28, %s892_s14 }
 0x1c1   : > { %659 = vrot.lane.b32.xlu1 %v496_v21, %s891_s13 }
 0x1c3   : > { %661 = vrot.lane.b32.xlu0 %v498_v28, %s891_s13 }
 0x1c5   : > { %683 = vrot.lane.b32.xlu1 %v496_v21, %s893_s15  ;;  %v538_v21 = vld [vmem:[%s1370_s1 + $0x38] sm:$0xff] }
 0x1c7   : > { %685 = vrot.lane.b32.xlu0 %v498_v28, %s893_s15 }
 0x1c9   : > { %725 = vperm.xlu1 %874, %v722_v37   ;;  %v561_v37 = vld [vmem:[%s1370_s1 + $0x50] sm:$0xff] }
 0x1fb   : > { %v500_v38 = vpop.permute.xlu1 %499 }
 0x1fd   : > { %v502_v39 = vpop.permute.xlu0 %501 }
 0x1ff   : > { %v524_v42 = vpop.permute.xlu1 %523 }
 0x201   : > { %v526_v45 = vpop.permute.xlu0 %525 }
 0x203   : > { %v548_v46 = vpop.permute.xlu1 %547 }
 0x205   : > { %v550_v47 = vpop.permute.xlu0 %549 }
 0x207   : > { %v572_v48 = vpop.permute.xlu1 %571 }
 0x209   : > { %v1199_v49 = vpop.permute.xlu0 %573 }
 0x20b   : > { %v1201_v50 = vpop.permute.xlu1 %607 }
 0x20d   : > { %v1203_v51 = vpop.permute.xlu0 %609 }
 0x20f   : > { %v1205_v52 = vpop.permute.xlu1 %631 }
 0x211   : > { %v1207_v53 = vpop.permute.xlu0 %633 }
 0x213   : > { %v1209_v54 = vpop.permute.xlu1 %655 }
 0x215   : > { %v1211_v57 = vpop.permute.xlu0 %657 }
 0x217   : > { %v504_v58 = vpop.permute.xlu1 %503 }
 0x218   : > { %v507_v59 = vsel %vm264_vm0, %v500_v38, %v504_v58  ;;  %v509_v60 = vsel %vm264_vm0, %v504_v58, %v500_v38 }
 0x219   : > { %v506_v63 = vpop.permute.xlu0 %505  ;;  %v515_v8 = vmul.f32 %v509_v60, %v1008_v15  ;;  %v516_v9 = vmul.f32 %v507_v59, %v1014_v16 }
 0x21a   : > { %v508_v4 = vsel %vm264_vm0, %v502_v39, %v506_v63  ;;  %v510_v6 = vsel %vm264_vm0, %v506_v63, %v502_v39 }
 0x21b   : > { %v517_v10 = vmul.f32 %v513_v61, %v510_v6  ;;  %v518_v11 = vmul.f32 %v514_v62, %v508_v4  ;;  %v528_v13 = vpop.permute.xlu1 %527 }
 0x21c   : > { %v531_v14 = vsel %vm279_vm1, %v524_v42, %v528_v13  ;;  %v533_v19 = vsel %vm279_vm1, %v528_v13, %v524_v42 }
 0x21d   : > { %v519_v15 = vpack.c.bf16 %v517_v10, %v515_v8  ;;  %v520_v22 = vpack.c.bf16 %v518_v11, %v516_v9  ;;  %v530_v16 = vpop.permute.xlu0 %529  ;;  %v539_v27 = vmul.f32 %v533_v19, %v1019_v17  ;;  %v540_v28 = vmul.f32 %v531_v14, %v1024_v18  ;;  %v562_v17 = vld [vmem:[%s1370_s1 + $0x58] sm:$0xff] }
 0x21e   : > { %v532_v23 = vsel %vm279_vm1, %v526_v45, %v530_v16  ;;  %v534_v26 = vsel %vm279_vm1, %v530_v16, %v526_v45 }
 0x21f   : > { %521 = vst [vmem:[#allocation2] sm:$0xff] %v519_v15  ;;  %522 = vst [vmem:[#allocation2 + $0x8] sm:$0xff] %v520_v22  ;;  %v541_v31 = vmul.f32 %v537_v20, %v534_v26  ;;  %v542_v32 = vmul.f32 %v538_v21, %v532_v23  ;;  %v552_v33 = vpop.permute.xlu1 %551  ;;  %738 = vmatprep.subr.bf16.mxu1 %v520_v22  ;;  %v622_v22 = vld [vmem:[%s1370_s1 + $0xb8] sm:$0xff] }
 0x220   : > { %v555_v34 = vsel %vm300_vm3, %v548_v46, %v552_v33  ;;  %v557_v3 = vsel %vm300_vm3, %v552_v33, %v548_v46  ;;  %739 = vmatpush1.bf16.msra.mxu1 %v519_v15 }
 0x221   : > { %v543_v18 = vpack.c.bf16 %v541_v31, %v539_v27  ;;  %v544_v38 = vpack.c.bf16 %v542_v32, %v540_v28  ;;  %v554_v39 = vpop.permute.xlu0 %553  ;;  %v563_v46 = vmul.f32 %v557_v3, %v1059_v43  ;;  %v564_v58 = vmul.f32 %v555_v34, %v1064_v44  ;;  %v586_v43 = vld [vmem:[%s1370_s1 + $0x78] sm:$0xff]  ;;  %v645_v34 = vld [vmem:[%s1370_s1 + $0xd0] sm:$0xff] }
 0x222   : > { %v556_v42 = vsel %vm300_vm3, %v550_v47, %v554_v39  ;;  %v558_v45 = vsel %vm300_vm3, %v554_v39, %v550_v47  ;;  %v585_v47 = vld [vmem:[%s1370_s1 + $0x70] sm:$0xff] }
 0x223   : > { %545 = vst [vmem:[#allocation2 + $0x10] sm:$0xff] %v543_v18  ;;  %546 = vst [vmem:[#allocation2 + $0x18] sm:$0xff] %v544_v38  ;;  %v565_v59 = vmul.f32 %v561_v37, %v558_v45  ;;  %v566_v60 = vmul.f32 %v562_v17, %v556_v42  ;;  %v576_v61 = vpop.permute.xlu1 %575  ;;  %740 = vmatprep.subr.bf16.mxu1 %v544_v38 }
 0x224   : > { %v579_v62 = vsel %vm315_vm2, %v572_v48, %v576_v61  ;;  %v581_v63 = vsel %vm315_vm2, %v576_v61, %v572_v48  ;;  %741 = vmatpush1.bf16.msra.mxu1 %v543_v18 }
 0x225   : > { %v567_v44 = vpack.c.bf16 %v565_v59, %v563_v46  ;;  %v568_v4 = vpack.c.bf16 %v566_v60, %v564_v58  ;;  %v578_v6 = vpop.permute.xlu0 %577  ;;  %v587_v9 = vmul.f32 %v581_v63, %v1042_v29  ;;  %v588_v10 = vmul.f32 %v579_v62, %v1047_v30  ;;  %v621_v30 = vld [vmem:[%s1370_s1 + $0xb0] sm:$0xff] }
 0x226   : > { %v580_v8 = vsel %vm315_vm2, %v1199_v49, %v578_v6  ;;  %v582_v48 = vsel %vm315_vm2, %v578_v6, %v1199_v49 }
 0x227   : > { %569 = vst [vmem:[#allocation2 + $0x20] sm:$0xff] %v567_v44  ;;  %570 = vst [vmem:[#allocation2 + $0x28] sm:$0xff] %v568_v4  ;;  %v589_v11 = vmul.f32 %v585_v47, %v582_v48  ;;  %v590_v13 = vmul.f32 %v586_v43, %v580_v8  ;;  %v680_v14 = vpop.permute.xlu1 %679  ;;  %742 = vmatprep.subr.bf16.mxu1 %v568_v4  ;;  %v693_v4 = vld [vmem:[%s1370_s1 + $0x110] sm:$0xff] }
 0x228   : > { %743 = vmatpush1.bf16.msra.mxu1 %v567_v44 }
 0x229   : > { %v591_v19 = vpack.c.bf16 %v589_v11, %v587_v9  ;;  %v592_v20 = vpack.c.bf16 %v590_v13, %v588_v10  ;;  %v682_v21 = vpop.permute.xlu0 %681 }
 0x22b   : > { %593 = vst [vmem:[#allocation2 + $0x30] sm:$0xff] %v591_v19  ;;  %594 = vst [vmem:[#allocation2 + $0x38] sm:$0xff] %v592_v20  ;;  %v612_v15 = vpop.permute.xlu1 %611  ;;  %744 = vmatprep.subr.bf16.mxu1 %v592_v20  ;;  %v851_v20 = vcombine.low %v1188_v2, %v1188_v2 }
 0x22c   : > { %v615_v49 = vsel %vm344_vm4, %v1201_v50, %v612_v15  ;;  %v617_v29 = vsel %vm344_vm4, %v612_v15, %v1201_v50  ;;  %745 = vmatpush1.bf16.msra.mxu1 %v591_v19 }
 0x22d   : > { %v614_v16 = vpop.permute.xlu0 %613  ;;  %746 = vmatprep.subr.bf16.mxu1 %v1156_v36  ;;  %v623_v26 = vmul.f32 %v615_v49, %v1076_v55  ;;  %v624_v27 = vmul.f32 %v617_v29, %v1081_v56  ;;  %v646_v55 = vld [vmem:[%s1370_s1 + $0xd8] sm:$0xff] }
 0x22e   : > { %v616_v23 = vsel %vm344_vm4, %v1203_v51, %v614_v16  ;;  %v618_v50 = vsel %vm344_vm4, %v614_v16, %v1203_v51 }
 0x22f   : > { %v625_v28 = vmul.f32 %v621_v30, %v616_v23  ;;  %v626_v31 = vmul.f32 %v622_v22, %v618_v50  ;;  %v636_v32 = vpop.permute.xlu1 %635 }
 0x230   : > { %v639_v33 = vsel %vm365_vm6, %v1205_v52, %v636_v32  ;;  %v641_v36 = vsel %vm365_vm6, %v636_v32, %v1205_v52  ;;  %747 = vmatpush1.bf16.msra.mxu1 %v1154_v35 }
 0x231   : > { %v627_v56 = vpack.c.bf16 %v625_v28, %v623_v26  ;;  %v628_v51 = vpack.c.bf16 %v626_v31, %v624_v27  ;;  %v638_v3 = vpop.permute.xlu0 %637  ;;  %v647_v17 = vmul.f32 %v639_v33, %v1110_v24  ;;  %v648_v18 = vmul.f32 %v641_v36, %v1115_v25  ;;  %v670_v24 = vld [vmem:[%s1370_s1 + $0xf8] sm:$0xff] }
 0x232   : > { %v640_v37 = vsel %vm365_vm6, %v1207_v53, %v638_v3  ;;  %v642_v52 = vsel %vm365_vm6, %v638_v3, %v1207_v53  ;;  %v669_v53 = vld [vmem:[%s1370_s1 + $0xf0] sm:$0xff] }
 0x233   : > { %v649_v38 = vmul.f32 %v645_v34, %v640_v37  ;;  %v650_v39 = vmul.f32 %v646_v55, %v642_v52  ;;  %v660_v42 = vpop.permute.xlu1 %659  ;;  %748 = vmatprep.subr.bf16.mxu1 %v628_v51 }
 0x234   : > { %v663_v35 = vsel %vm380_vm5, %v1209_v54, %v660_v42  ;;  %v665_v45 = vsel %vm380_vm5, %v660_v42, %v1209_v54  ;;  %749 = vmatpush1.bf16.msra.mxu1 %v627_v56 }
 0x235   : > { %v651_v25 = vpack.c.bf16 %v649_v38, %v647_v17  ;;  %v652_v46 = vpack.c.bf16 %v650_v39, %v648_v18  ;;  %v662_v58 = vpop.permute.xlu0 %661  ;;  %v671_v60 = vmul.f32 %v663_v35, %v1093_v5  ;;  %v672_v61 = vmul.f32 %v665_v45, %v1098_v7  ;;  %v694_v5 = vld [vmem:[%s1370_s1 + $0x118] sm:$0xff] }
 0x236   : > { %v664_v59 = vsel %vm380_vm5, %v1211_v57, %v662_v58  ;;  %v666_v54 = vsel %vm380_vm5, %v662_v58, %v1211_v57 }
 0x237   : > { %v673_v62 = vmul.f32 %v669_v53, %v664_v59  ;;  %v674_v63 = vmul.f32 %v670_v24, %v666_v54  ;;  %v684_v47 = vpop.permute.xlu1 %683  ;;  %750 = vmatprep.subr.bf16.mxu1 %v652_v46 }
 0x238   : > { %v687_v43 = vsel %vm401_vm7, %v680_v14, %v684_v47  ;;  %v689_v44 = vsel %vm401_vm7, %v684_v47, %v680_v14  ;;  %751 = vmatpush1.bf16.msra.mxu1 %v651_v25 }
 0x239   : > { %v675_v7 = vpack.c.bf16 %v673_v62, %v671_v60  ;;  %v676_v57 = vpack.c.bf16 %v674_v63, %v672_v61  ;;  %v686_v6 = vpop.permute.xlu0 %685  ;;  %v695_v9 = vmul.f32 %v687_v43, %v1127_v40  ;;  %v696_v10 = vmul.f32 %v689_v44, %v1132_v41 }
 0x23a   : > { %v688_v8 = vsel %vm401_vm7, %v682_v21, %v686_v6  ;;  %v690_v48 = vsel %vm401_vm7, %v686_v6, %v682_v21 }
 0x23b   : > { %v697_v11 = vmul.f32 %v693_v4, %v688_v8  ;;  %v698_v13 = vmul.f32 %v694_v5, %v690_v48  ;;  %752 = vmatprep.subr.bf16.mxu1 %v676_v57 }
 0x23c   : > { %753 = vmatpush1.bf16.msra.mxu1 %v675_v7 }
 0x23d   : > { %v699_v14 = vpack.c.bf16 %v697_v11, %v695_v9  ;;  %v700_v19 = vpack.c.bf16 %v698_v13, %v696_v10 }
 0x23f   : > { %754 = vmatprep.subr.bf16.mxu1 %v700_v19 }
 0x240   : > { %755 = vmatpush1.bf16.msra.mxu1 %v699_v14 }
 0x243   : > { %771 = vmatmul.mubr.bf16.vlgmr.msra.gmra.mrb[0].mxu1 %v851_v20 }
 0x248   : > { %v726_v15 = vpop.permute.xlu1 %725 }
 0x316   : > { %v772_v12 = vpop.f32.mrb[0].mxu1 }
 0x317   : > { %v773_v21 = vadd.f32 %v772_v12, %v726_v15  ;;  %v774_v49 = vpop.f32.mrb[1].mxu1 }
 0x318   : > { %v775_v40 = vadd.f32 %v774_v49, %v726_v15  ;;  %v776_v41 = vpop.f32.mrb[2].mxu1 }
 0x319   : > { %v779_v29 = vadd.f32 %v773_v21, %v946_v0  ;;  %v777_v30 = vpop.f32.mrb[3].mxu1 }
 0x31a   : > { %v780_v22 = vadd.f32 %v775_v40, %v952_v1 }
 0x31b   : > { %781 = vst [vmem:[%s253_s9] sm:$0xff] %v779_v29 }
 0x31c   : > { %782 = vst [vmem:[%s253_s9 + $0x8] sm:$0xff] %v780_v22 }
 0x31d PF: > { %s16_s21 = sadd.s32 1, %s884_s21  }
 0x31e   : > { %p13_p4 = scmp.ge.s32.totalorder %s16_s21, 4  }
 0x320   :  { %15 = sbr.rel (!%p13_p4) target bundleno = 1 (0x1), region = 74 }

</bundles_post_ra>
